<compile_context>
chip_gen: v7x
topology: tpu7x:2x2x1
jax: 0.10.0
libtpu: 0.0.40
codegen_flags: <defaults>
</compile_context>

<pallas_src>
import jax
import jax.numpy as jnp
from jax import lax
from jax.experimental import pallas as pl
from jax.experimental.pallas import tpu as pltpu

LANES = 128                               # lane tile (last dim)
MAX_TILE_BYTES = 2 * 1024 * 1024          # per-input block (~85%+ of roofline)
VMEM_LIMIT_BYTES = 32 * 1024 * 1024       # safe on v5e/v6e/v7x
PALLAS_MIN_ROWS = 64                      # leaves with < 64 full rows -> jnp
MIN_PALLAS_TOTAL_BYTES = 4 * 1024 * 1024  # below this, plain jnp wins outright
FACTOR = 0.001                            # default `factor` of the module


def _round_up(x: int, m: int) -> int:
    return ((x + m - 1) // m) * m


def _cdiv(a: int, b: int) -> int:
    return -(-a // b)


def _num_tensorcores() -> int:
    """2 on v7x (megacore split pays off); 1 on single-TC v5e/v6e."""
    try:
        kind = jax.devices()[0].device_kind.lower()
    except Exception:
        return 1
    return 2 if "v7" in kind else 1


# ----------------------------- Pallas kernel ------------------------------ #
def _make_leaf_kernel(rows: int, tile_rows: int, tiles_per_core: int,
                      need_mask: bool):
    def kernel(p_ref, g_ref, o_ref):
        t = pl.program_id(1)

        # Output block index depends only on the core axis, so it stays
        # resident in VMEM across the whole tile sweep; zero it on tile 0.
        @pl.when(t == 0)
        def _():
            o_ref[...] = jnp.zeros_like(o_ref)

        p = p_ref[...].astype(jnp.float32)      # widening cast hides under DMA
        g = g_ref[...].astype(jnp.float32)
        # exp(-|g|) rides the EUP; abs/mul/add are VPU work under the DMAs.
        val = jnp.exp(-jnp.abs(g)) * p * p

        if need_mask:
            # Mask rows beyond the leaf's true extent (partial last tile and,
            # with 2 cores, a possibly duplicated overflow tile).
            c = pl.program_id(0)
            base = (c * tiles_per_core + t) * tile_rows
            row = base + lax.broadcasted_iota(jnp.int32, val.shape, 0)
            val = jnp.where(row < rows, val, 0.0)

        # Reduce the tile to one (8, 128) vreg: pure VPU adds, layout kept.
        o_ref[...] += val.reshape(tile_rows // 8, 8, LANES).sum(axis=0)

    return kernel


def _pallas_leaf_sum(p2, g2, rows: int, *, num_cores: int,
                     max_tile_bytes: int = MAX_TILE_BYTES):
    """sum(exp(-|g|) * p^2) over one (rows, 128) leaf view, via Pallas."""
    itemsize = p2.dtype.itemsize
    sublane = 8 * max(1, 4 // itemsize)        # 8 (f32) / 16 (bf16) / 32 (int8)
    max_tile_rows = max(sublane,
                        (max_tile_bytes // (LANES * itemsize)) // sublane * sublane)
    # tile_rows <= rows so blocks never exceed the array extent.
    tile_rows = min(max_tile_rows, max(sublane, (rows // sublane) * sublane))

    num_tiles = _cdiv(rows, tile_rows)
    num_cores_eff = max(1, min(num_cores, num_tiles))
    tiles_per_core = _cdiv(num_tiles, num_cores_eff)
    # Mask if the last logical tile runs past the leaf (partial tile, or an
    # overflow tile created by rounding tiles_per_core up for 2 cores).
    need_mask = num_cores_eff * tiles_per_core * tile_rows > rows
    need_clamp = num_cores_eff * tiles_per_core > num_tiles
    last_tile = num_tiles - 1

    if need_clamp:
        # Overflow tiles re-fetch the last valid block (in-bounds DMA); their
        # *logical* row index is still >= rows, so the mask zeroes them.
        def in_map(c, t):
            return (jnp.minimum(c * tiles_per_core + t, last_tile), 0)
    else:
        def in_map(c, t):
            return (c * tiles_per_core + t, 0)

    out_map = lambda c, t: (c, 0)

    kernel = _make_leaf_kernel(rows, tile_rows, tiles_per_core, need_mask)
    n = rows * LANES

    out = pl.pallas_call(
        kernel,
        out_shape=jax.ShapeDtypeStruct((num_cores_eff * 8, LANES), jnp.float32),
        grid_spec=pltpu.PrefetchScalarGridSpec(
            num_scalar_prefetch=0,
            grid=(num_cores_eff, tiles_per_core),
            in_specs=[
                pl.BlockSpec((tile_rows, LANES), in_map),
                pl.BlockSpec((tile_rows, LANES), in_map),
            ],
            out_specs=pl.BlockSpec((8, LANES), out_map),
        ),
        compiler_params=pltpu.CompilerParams(
            dimension_semantics=("parallel", "arbitrary"),
            vmem_limit_bytes=VMEM_LIMIT_BYTES,
        ),
        cost_estimate=pl.CostEstimate(
            flops=4 * n,
            transcendentals=n,
            bytes_accessed=2 * n * itemsize + num_cores_eff * 8 * LANES * 4,
        ),
    )(p2, g2)

    # Tiny final reduction (<= 2 KiB of f32), done once per leaf in XLA.
    return jnp.sum(out)


# --------------------------- jnp fallback pieces --------------------------- #
def _reg_term_jnp(p, g):
    p32 = p.astype(jnp.float32)
    g32 = g.astype(jnp.float32)
    return jnp.sum(jnp.exp(-jnp.abs(g32)) * p32 * p32)


def _adaptive_reg_sum(p_leaves, g_leaves, *, use_pallas: bool, num_cores: int):
    """sum(exp(-|g|) * p^2) over all leaves."""
    total = jnp.float32(0.0)
    jnp_pieces = []
    for p, g in zip(p_leaves, g_leaves):
        g = g.astype(p.dtype)               # grads share param dtype (no upcast)
        n = int(p.size)
        rows = n // LANES
        if use_pallas and rows >= PALLAS_MIN_ROWS:
            pf = jnp.ravel(p)
            gf = jnp.ravel(g)
            n_main = rows * LANES
            if n_main == n:
                p2 = pf.reshape(rows, LANES)     # free reshape, no copy
                g2 = gf.reshape(rows, LANES)
            else:
                # Rare ragged leaf: prefix slice + tiny (<128 elem) jnp tail.
                p2 = pf[:n_main].reshape(rows, LANES)
                g2 = gf[:n_main].reshape(rows, LANES)
                jnp_pieces.append((pf[n_main:], gf[n_main:]))
            total = total + _pallas_leaf_sum(p2, g2, rows, num_cores=num_cores)
        else:
            jnp_pieces.append((p, g))
    for p, g in jnp_pieces:
        total = total + _reg_term_jnp(p, g)
    return total


# ------------------------ "module" forward wrapper ------------------------- #
def adaptive_regularization_loss(params, main_loss_fn, *loss_args,
                                 factor: float = FACTOR,
                                 force_pallas: bool = False) -> jax.Array:
    """JAX equivalent of AdaptiveRegularizationLoss.forward(model, main_loss)."""
    grads = jax.grad(main_loss_fn)(params, *loss_args)
    # TODO(synk): torch's allow_unused=True skips params with grad=None; in JAX
    # every leaf gets a (zero) gradient, which only differs for parameters that
    # are fully disconnected from the loss graph (none in this model).
    p_leaves = jax.tree_util.tree_leaves(params)
    g_leaves = jax.tree_util.tree_leaves(grads)
    total_bytes = sum(int(x.size) * x.dtype.itemsize for x in p_leaves)
    use_pallas = force_pallas or total_bytes >= MIN_PALLAS_TOTAL_BYTES
    reg = _adaptive_reg_sum(p_leaves, g_leaves, use_pallas=use_pallas,
                            num_cores=_num_tensorcores())
    return jnp.float32(factor) * reg


# --------------------------- synthetic model ------------------------------- #
def _init_params(key):
    k1, k2, k3, k4 = jax.random.split(key, 4)
    # conv: weight OIHW (8, 4, 3, 3), bias (8,)  -- NCHW convention
    w_conv = 0.1 * jax.random.normal(k1, (8, 4, 3, 3), jnp.float32)
    b_conv = 0.1 * jax.random.normal(k2, (8,), jnp.float32)
    # linear: (8*16*16, 10)
    w_fc = 0.05 * jax.random.normal(k3, (8 * 16 * 16, 10), jnp.float32)
    b_fc = 0.05 * jax.random.normal(k4, (10,), jnp.float32)
    return {"w_conv": w_conv, "b_conv": b_conv, "w_fc": w_fc, "b_fc": b_fc}


def _model_apply(params, x):
    # x: NCHW (2, 4, 16, 16)
    y = lax.conv_general_dilated(
        x, params["w_conv"],
        window_strides=(1, 1), padding="SAME",
        dimension_numbers=("NCHW", "OIHW", "NCHW"))
    y = y + params["b_conv"][None, :, None, None]
    y = jax.nn.relu(y)
    y = y.reshape(y.shape[0], -1)
    return y @ params["w_fc"] + params["b_fc"]


def _main_loss_fn(params, x, target):
    pred = _model_apply(params, x)
    return jnp.mean((pred - target) ** 2)


def _reference(params, main_loss_fn, *loss_args, factor=FACTOR):
    grads = jax.grad(main_loss_fn)(params, *loss_args)
    total = 0.0
    for p, g in zip(jax.tree_util.tree_leaves(params),
                    jax.tree_util.tree_leaves(grads)):
        total += jnp.sum(jnp.exp(-jnp.abs(g)) * p ** 2)
    return factor * total


if __name__ == "__main__":
    key = jax.random.PRNGKey(0)
    k_p, k_x, k_t, k_a, k_b, k_c, k_d = jax.random.split(key, 7)

    params = _init_params(k_p)
    x = jax.random.normal(k_x, (2, 4, 16, 16), jnp.float32)       # NCHW input
    target = jax.random.normal(k_t, (2, 10), jnp.float32)

    # Full module forward, forced through the Pallas path so the kernel runs.
    loss = adaptive_regularization_loss(params, _main_loss_fn, x, target,
                                        factor=FACTOR, force_pallas=True)
    loss = jax.block_until_ready(loss)
    ref = jax.block_until_ready(
        _reference(params, _main_loss_fn, x, target, factor=FACTOR))
    assert jnp.allclose(loss, ref, rtol=1e-4, atol=1e-6), (loss, ref)

    # Auto-dispatch path (tiny model -> plain-jnp fast path) must agree too.
    loss_auto = jax.block_until_ready(
        adaptive_regularization_loss(params, _main_loss_fn, x, target,
                                     factor=FACTOR))
    assert jnp.allclose(loss_auto, ref, rtol=1e-4, atol=1e-6), (loss_auto, ref)

    # Self-test 1: ragged leaf (size not a multiple of 128) via the wrapper.
    p_r = jax.random.normal(k_a, (1000, 130), jnp.float32)
    g_r = jax.random.normal(k_b, (1000, 130), jnp.float32)
    got = _adaptive_reg_sum([p_r], [g_r], use_pallas=True,
                            num_cores=_num_tensorcores())
    want = _reg_term_jnp(p_r, g_r)
    got, want = jax.block_until_ready((got, want))
    assert jnp.allclose(got, want, rtol=1e-4, atol=1e-4), (got, want)

    # Self-test 2: multi-tile + partial last tile + mask + 2-core overflow tile
    # (small tile override; runs as a sequential loop on single-core chips).
    p_m = jax.random.normal(k_c, (601, 128), jnp.float32)
    g_m = jax.random.normal(k_d, (601, 128), jnp.float32)
    got_m = _pallas_leaf_sum(p_m, g_m, 601, num_cores=2,
                             max_tile_bytes=128 * 1024)   # tile_rows = 256
    want_m = _reg_term_jnp(p_m, g_m)
    got_m, want_m = jax.block_until_ready((got_m, want_m))
    assert jnp.allclose(got_m, want_m, rtol=1e-4, atol=1e-4), (got_m, want_m)

    # Self-test 3: bf16 leaf -- native-dtype streaming, in-kernel f32 cast.
    p_bf = (0.1 * jax.random.normal(k_a, (512, 256), jnp.float32)).astype(jnp.bfloat16)
    g_bf = (0.1 * jax.random.normal(k_b, (512, 256), jnp.float32)).astype(jnp.bfloat16)
    got_bf = _adaptive_reg_sum([p_bf], [g_bf], use_pallas=True,
                               num_cores=_num_tensorcores())
    want_bf = _reg_term_jnp(p_bf, g_bf)
    got_bf, want_bf = jax.block_until_ready((got_bf, want_bf))
    assert jnp.allclose(got_bf, want_bf, rtol=1e-4, atol=1e-4), (got_bf, want_bf)

    print("KERNEL_OK")
</pallas_src>

<mosaic_0001>
module attributes {stable_mosaic.version = 11 : i64} {
  func.func @kernel(%arg0: i32, %arg1: i32, %arg2: memref<160x128xf32, #tpu.memory_space<vmem>>, %arg3: memref<160x128xf32, #tpu.memory_space<vmem>>, %arg4: memref<8x128xf32, #tpu.memory_space<vmem>>) attributes {dimension_semantics = [#tpu.dimension_semantics<parallel>, #tpu.dimension_semantics<arbitrary>], iteration_bounds = array<i64: 1, 1>, scalar_prefetch = 0 : i64, scratch_operands = 0 : i64, tpu.core_type = #tpu.core_type<tc>, window_params = [{transform_indices = @transform_0, window_bounds = array<i64: 160, 128>}, {transform_indices = @transform_1, window_bounds = array<i64: 160, 128>}, {transform_indices = @transform_2, window_bounds = array<i64: 8, 128>}]} {
    %c0_i32 = arith.constant 0 : i32
    %0 = arith.cmpi eq, %arg1, %c0_i32 : i32
    %1 = arith.extui %0 : i1 to i32
    %c0_i32_0 = arith.constant 0 : i32
    %2 = arith.cmpi ne, %1, %c0_i32_0 : i32
    scf.if %2 {
      %cst_9 = arith.constant 0.000000e+00 : f32
      %16 = vector.broadcast %cst_9 : f32 to vector<8x128xf32>
      %c0_10 = arith.constant 0 : index
      %c0_11 = arith.constant 0 : index
      %17 = vector.load %arg4[%c0_10, %c0_11] : memref<8x128xf32, #tpu.memory_space<vmem>>, vector<8x128xf32>
      tpu.vector_store %arg4[%c0_10, %c0_11], %16 {strides = array<i32>} : memref<8x128xf32, #tpu.memory_space<vmem>>, vector<8x128xf32>,
    } else {
    }
    %c0 = arith.constant 0 : index
    %c0_1 = arith.constant 0 : index
    %3 = vector.load %arg2[%c0, %c0_1] : memref<160x128xf32, #tpu.memory_space<vmem>>, vector<160x128xf32>
    %c0_2 = arith.constant 0 : index
    %c0_3 = arith.constant 0 : index
    %4 = vector.load %arg3[%c0_2, %c0_3] : memref<160x128xf32, #tpu.memory_space<vmem>>, vector<160x128xf32>
    %5 = math.absf %4 : vector<160x128xf32>
    %cst = arith.constant 0.000000e+00 : f32
    %6 = vector.broadcast %cst : f32 to vector<160x128xf32>
    %7 = arith.subf %6, %5 : vector<160x128xf32>
    %8 = math.exp %7 : vector<160x128xf32>
    %9 = arith.mulf %8, %3 : vector<160x128xf32>
    %10 = arith.mulf %9, %3 : vector<160x128xf32>
    %c0_4 = arith.constant 0 : index
    %c0_5 = arith.constant 0 : index
    %11 = vector.load %arg4[%c0_4, %c0_5] : memref<8x128xf32, #tpu.memory_space<vmem>>, vector<8x128xf32>
    %12 = vector.shape_cast %10 : vector<160x128xf32> to vector<20x8x128xf32>
    %cst_6 = arith.constant dense<0.000000e+00> : vector<8x128xf32>
    %13 = vector.multi_reduction <add>, %12, %cst_6 [0] : vector<20x8x128xf32> to vector<8x128xf32>
    %14 = arith.addf %11, %13 : vector<8x128xf32>
    %c0_7 = arith.constant 0 : index
    %c0_8 = arith.constant 0 : index
    %15 = vector.load %arg4[%c0_7, %c0_8] : memref<8x128xf32, #tpu.memory_space<vmem>>, vector<8x128xf32>
    tpu.vector_store %arg4[%c0_7, %c0_8], %14 {strides = array<i32>} : memref<8x128xf32, #tpu.memory_space<vmem>>, vector<8x128xf32>,
    return
  }
  func.func @transform_0(%arg0: i32, %arg1: i32) -> (i32, i32) {
    %c1_i32 = arith.constant 1 : i32
    %0 = arith.muli %arg0, %c1_i32 : i32
    %1 = arith.addi %0, %arg1 : i32
    %c0_i32 = arith.constant 0 : i32
    %c0_i32_0 = arith.constant 0 : i32
    return %1, %c0_i32 : i32, i32
  }
  func.func @transform_1(%arg0: i32, %arg1: i32) -> (i32, i32) {
    %c1_i32 = arith.constant 1 : i32
    %0 = arith.muli %arg0, %c1_i32 : i32
    %1 = arith.addi %0, %arg1 : i32
    %c0_i32 = arith.constant 0 : i32
    %c0_i32_0 = arith.constant 0 : i32
    return %1, %c0_i32 : i32, i32
  }
  func.func @transform_2(%arg0: i32, %arg1: i32) -> (i32, i32) {
    %c0_i32 = arith.constant 0 : i32
    %c0_i32_0 = arith.constant 0 : i32
    return %arg0, %c0_i32 : i32, i32
  }
}

</mosaic_0001>

<bundles_post_ra>
// kernel: tpu_custom_call.1
= control target key start
LH: loop header
LB: loop body
LE: loop exit
PB: predicated region body
PF: predicated region fallthrough
CT: control target
= control target key end

     0   :  { %7 = vsyncpa [#allocation3], 0  ;;  %s429_s0 = inlined_call_operand.hbm [shape: f32[160,128], index: 0, kind: input, shape index: {}]   ;;  %s430_s1 = inlined_call_operand.hbm [shape: f32[160,128], index: 1, kind: input, shape index: {}]   ;;  %s431_s2 = inlined_call_operand.hbm [shape: f32[8,128], index: 2, kind: output, shape index: {}]  }
   0x1   :  { %8 = vsyncpa [#allocation6], 0 }
   0x2   :  { %9 = vsyncpa [#allocation4], 0  ;;  %s373_s9 = smov [#allocation2]   ;;  %s301_s13 = scalar_lea.hbm %s429_s0, 2560 }
   0x3   :  { %s19_s10 = sshll.u32 %s373_s9, 4  ;;  %p302_p0 = scmp.ne.s32.totalorder %s429_s0, %s301_s13  ;;  %s20_s10 = int_to_ptr.vmem [resolvable:$true] %s19_s10 }
   0x4   :  { %p305_p1 = scmp.lt.u32.totalorder %s301_s13, %s429_s0 }
   0x6   :  { %p307_p2 = pnand %p305_p1, %p302_p0 }
   0x8   :  { %310 = shalt.err (!%p307_p2)
}
   0x9   :  { %s311_s18 = scalar_lea.vmem %s20_s10, 2560  ;;  %p316_p4 = scmp.lt.s32.totalorder %s20_s10, %s20_s10 }
   0xa   :  { %p312_p3 = scmp.ne.s32.totalorder %s20_s10, %s311_s18  ;;  %p317_p5 = scmp.lt.s32.totalorder %s311_s18, %s311_s18 }
   0xc   :  { %p318_p6 = por %p317_p5, %p316_p4 }
   0xe   :  { %p319_p7 = pnand %p318_p6, %p312_p3 }
  0x10   :  { %322 = shalt.err (!%p319_p7)
}
  0x11   :  { %s374_s19 = smov 128   ;;  %s375_s20 = smov 8  }
  0x12   :  { %25 = dma.hbm_to_vmem [thread:$0]  %s429_s0, 2560, %s20_s10, [#allocation3], %s374_s19, %s374_s19, %s375_s20  }
  0x13   :  { %s376_s23 = smov [#allocation5]   ;;  %s323_s27 = scalar_lea.hbm %s430_s1, 2560 }
  0x14   :  { %s35_s24 = sshll.u32 %s376_s23, 4  ;;  %p324_p8 = scmp.ne.s32.totalorder %s430_s1, %s323_s27  ;;  %s36_s24 = int_to_ptr.vmem [resolvable:$true] %s35_s24 }
  0x15   :  { %p327_p9 = scmp.lt.u32.totalorder %s323_s27, %s430_s1 }
  0x17   :  { %p329_p10 = pnand %p327_p9, %p324_p8 }
  0x19   :  { %332 = shalt.err (!%p329_p10)
}
  0x1a   :  { %s333_s4 = scalar_lea.vmem %s36_s24, 2560  ;;  %p338_p12 = scmp.lt.s32.totalorder %s36_s24, %s36_s24 }
  0x1b   :  { %p334_p11 = scmp.ne.s32.totalorder %s36_s24, %s333_s4  ;;  %p339_p13 = scmp.lt.s32.totalorder %s333_s4, %s333_s4 }
  0x1d   :  { %p340_p0 = por %p339_p13, %p338_p12 }
  0x1f   :  { %p341_p1 = pnand %p340_p0, %p334_p11 }
  0x21   :  { %344 = shalt.err (!%p341_p1)
}
  0x22   :  { %41 = dma.hbm_to_vmem [thread:$0]  %s430_s1, 2560, %s36_s24, [#allocation6], %s374_s19, %s374_s19, %s375_s20  }
  0x23   :  { %367 = dma.done.wait [#allocation3], 2560  }
  0x24   :  { %368 = vsyncadd [#allocation3], 4294964736 }
  0x25   :  { %369 = dma.done.wait [#allocation6], 2560  }
  0x26   :  { %370 = vsyncadd [#allocation6], 4294964736  ;;  %v77_v0 = vld [vmem:[#allocation5] sm:$0xff]  ;;  %v78_v1 = vld [vmem:[#allocation5 + $0x8] sm:$0xff]  ;;  %s377_s1 = smov [#allocation7]  }
  0x27   :  { %v79_v2 = vld [vmem:[#allocation5 + $0x10] sm:$0xff]  ;;  %v80_v3 = vld [vmem:[#allocation5 + $0x18] sm:$0xff]  ;;  %v81_v4 = vld [vmem:[#allocation5 + $0x20] sm:$0xff]  ;;  %v97_v6 = vand.u32 2147483647, %v77_v0  ;;  %s245_s6 = sshll.u32 %s377_s1, 4  ;;  %s246_s6 = int_to_ptr.vmem [resolvable:$true] %s245_s6 }
  0x28   :  { %v82_v5 = vld [vmem:[#allocation5 + $0x28] sm:$0xff]  ;;  %v98_v7 = vand.u32 2147483647, %v78_v1  ;;  %v83_v8 = vld [vmem:[#allocation5 + $0x30] sm:$0xff]  ;;  %v84_v9 = vld [vmem:[#allocation5 + $0x38] sm:$0xff]  ;;  %s345_s7 = scalar_lea.vmem %s246_s6, 128  ;;  %p350_p3 = scmp.lt.s32.totalorder %s246_s6, %s246_s6 }
  0x29   :  { %v99_v10 = vand.u32 2147483647, %v79_v2  ;;  %v100_v11 = vand.u32 2147483647, %v80_v3  ;;  %v101_v12 = vand.u32 2147483647, %v81_v4  ;;  %p346_p2 = scmp.ne.s32.totalorder %s246_s6, %s345_s7  ;;  %p351_p4 = scmp.lt.s32.totalorder %s345_s7, %s345_s7 }
  0x2a   :  { %v102_v13 = vand.u32 2147483647, %v82_v5  ;;  %v85_v14 = vld [vmem:[#allocation5 + $0x40] sm:$0xff]  ;;  %v103_v15 = vand.u32 2147483647, %v83_v8  ;;  %v117_v17 = vsub.f32 0.0, %v97_v6 }
  0x2b   :  { %v104_v16 = vand.u32 2147483647, %v84_v9  ;;  %v86_v18 = vld [vmem:[#allocation5 + $0x48] sm:$0xff]  ;;  %v118_v19 = vsub.f32 0.0, %v98_v7  ;;  %v119_v20 = vsub.f32 0.0, %v99_v10  ;;  %v120_v21 = vsub.f32 0.0, %v100_v11  ;;  %p352_p5 = por %p351_p4, %p350_p3 }
  0x2c   :  { %v121_v22 = vsub.f32 0.0, %v101_v12  ;;  %v87_v23 = vld [vmem:[#allocation5 + $0x50] sm:$0xff]  ;;  %v105_v24 = vand.u32 2147483647, %v85_v14  ;;  %v122_v25 = vsub.f32 0.0, %v102_v13  ;;  %v123_v27 = vsub.f32 0.0, %v103_v15 }
  0x2d   :  { %v106_v26 = vand.u32 2147483647, %v86_v18  ;;  %v124_v28 = vsub.f32 0.0, %v104_v16  ;;  %v137_v29 = vmul.f32 1.442695, %v117_v17  ;;  %v88_v33 = vld [vmem:[#allocation5 + $0x58] sm:$0xff]  ;;  %p353_p6 = pnand %p352_p5, %p346_p2 }
  0x2e   :  { %v139_v30 = vmul.f32 1.442695, %v118_v19  ;;  %v141_v31 = vmul.f32 1.442695, %v119_v20  ;;  %v143_v32 = vmul.f32 1.442695, %v120_v21 }
  0x2f   :  { %261 = vpow2.f32 %v137_v29  ;;  %v145_v34 = vmul.f32 1.442695, %v121_v22  ;;  %v107_v35 = vand.u32 2147483647, %v87_v23  ;;  %v125_v36 = vsub.f32 0.0, %v105_v24  ;;  %v89_v38 = vld [vmem:[#allocation5 + $0x60] sm:$0xff] }
  0x30   :  { %263 = vpow2.f32 %v139_v30  ;;  %v147_v37 = vmul.f32 1.442695, %v122_v25  ;;  %v149_v39 = vmul.f32 1.442695, %v123_v27  ;;  %v108_v40 = vand.u32 2147483647, %v88_v33 }
  0x31   :  { %265 = vpow2.f32 %v141_v31  ;;  %v126_v41 = vsub.f32 0.0, %v106_v26  ;;  %v151_v42 = vmul.f32 1.442695, %v124_v28  ;;  %v90_v43 = vld [vmem:[#allocation5 + $0x68] sm:$0xff]  ;;  %v91_v44 = vld [vmem:[#allocation5 + $0x70] sm:$0xff]  ;;  %v127_v46 = vsub.f32 0.0, %v107_v35 }
  0x32   :  { %267 = vpow2.f32 %v143_v32  ;;  %v109_v45 = vand.u32 2147483647, %v89_v38  ;;  %v153_v47 = vmul.f32 1.442695, %v125_v36  ;;  %v92_v48 = vld [vmem:[#allocation5 + $0x78] sm:$0xff]  ;;  %v128_v50 = vsub.f32 0.0, %v108_v40 }
  0x33   :  { %269 = vpow2.f32 %v145_v34  ;;  %v110_v49 = vand.u32 2147483647, %v90_v43  ;;  %v155_v51 = vmul.f32 1.442695, %v126_v41  ;;  %v57_v52 = vld [vmem:[#allocation2] sm:$0xff]  ;;  %v58_v54 = vld [vmem:[#allocation2 + $0x8] sm:$0xff] }
  0x34   :  { %271 = vpow2.f32 %v147_v37  ;;  %v111_v53 = vand.u32 2147483647, %v91_v44  ;;  %v93_v55 = vld [vmem:[#allocation5 + $0x80] sm:$0xff]  ;;  %v129_v56 = vsub.f32 0.0, %v109_v45  ;;  %v157_v57 = vmul.f32 1.442695, %v127_v46 }
  0x35   :  { %273 = vpow2.f32 %v149_v39  ;;  %v59_v59 = vld [vmem:[#allocation2 + $0x10] sm:$0xff]  ;;  %v112_v60 = vand.u32 2147483647, %v92_v48  ;;  %v60_v62 = vld [vmem:[#allocation2 + $0x18] sm:$0xff]  ;;  %v94_v63 = vld [vmem:[#allocation5 + $0x88] sm:$0xff]  ;;  %v130_v0 = vsub.f32 0.0, %v110_v49 }
  0x36   :  { %275 = vpow2.f32 %v151_v42  ;;  %v159_v1 = vmul.f32 1.442695, %v128_v50  ;;  %v61_v4 = vld [vmem:[#allocation2 + $0x20] sm:$0xff]  ;;  %v113_v5 = vand.u32 2147483647, %v93_v55  ;;  %v131_v6 = vsub.f32 0.0, %v111_v53 }
  0x37   :  { %277 = vpow2.f32 %v153_v47  ;;  %v62_v9 = vld [vmem:[#allocation2 + $0x28] sm:$0xff]  ;;  %v161_v10 = vmul.f32 1.442695, %v129_v56  ;;  %v95_v14 = vld [vmem:[#allocation5 + $0x90] sm:$0xff]  ;;  %v114_v15 = vand.u32 2147483647, %v94_v63 }
  0x38   :  { %279 = vpow2.f32 %v155_v51  ;;  %v132_v16 = vsub.f32 0.0, %v112_v60  ;;  %v63_v20 = vld [vmem:[#allocation2 + $0x30] sm:$0xff]  ;;  %v163_v21 = vmul.f32 1.442695, %v130_v0  ;;  %v96_v25 = vld [vmem:[#allocation5 + $0x98] sm:$0xff]  ;;  %v133_v32 = vsub.f32 0.0, %v113_v5 }
  0x39   :  { %v262_v58 = vpop.eup %261  ;;  %281 = vpow2.f32 %v157_v57  ;;  %v64_v30 = vld [vmem:[#allocation2 + $0x38] sm:$0xff]  ;;  %v115_v31 = vand.u32 2147483647, %v95_v14  ;;  %v165_v33 = vmul.f32 1.442695, %v131_v6  ;;  %v65_v38 = vld [vmem:[#allocation2 + $0x40] sm:$0xff] }
  0x3a   :  { %v264_v61 = vpop.eup %263  ;;  %v177_v2 = vmul.f32 %v262_v58, %v57_v52  ;;  %283 = vpow2.f32 %v159_v1  ;;  %v116_v39 = vand.u32 2147483647, %v96_v25  ;;  %v134_v40 = vsub.f32 0.0, %v114_v15  ;;  %v66_v46 = vld [vmem:[#allocation2 + $0x48] sm:$0xff]  ;;  %v67_v53 = vld [vmem:[#allocation2 + $0x50] sm:$0xff]  ;;  %v68_v60 = vld [vmem:[#allocation2 + $0x58] sm:$0xff] }
  0x3b   :  { %v266_v3 = vpop.eup %265  ;;  %v178_v7 = vmul.f32 %v264_v61, %v58_v54  ;;  %285 = vpow2.f32 %v161_v10  ;;  %v167_v41 = vmul.f32 1.442695, %v132_v16  ;;  %v135_v47 = vsub.f32 0.0, %v115_v31 }
  0x3c   :  { %v268_v8 = vpop.eup %267  ;;  %v179_v11 = vmul.f32 %v266_v3, %v59_v59  ;;  %v197_v12 = vmul.f32 %v177_v2, %v57_v52  ;;  %287 = vpow2.f32 %v163_v21  ;;  %v169_v48 = vmul.f32 1.442695, %v133_v32  ;;  %v69_v2 = vld [vmem:[#allocation2 + $0x60] sm:$0xff] }
  0x3d   :  { %v270_v13 = vpop.eup %269  ;;  %v180_v17 = vmul.f32 %v268_v8, %v60_v62  ;;  %v198_v18 = vmul.f32 %v178_v7, %v58_v54  ;;  %289 = vpow2.f32 %v165_v33  ;;  %v136_v54 = vsub.f32 0.0, %v116_v39  ;;  %v70_v8 = vld [vmem:[#allocation2 + $0x68] sm:$0xff]  ;;  %v75_v33 = vld [vmem:[#allocation2 + $0x90] sm:$0xff] }
  0x3e   :  { %v272_v19 = vpop.eup %271  ;;  %v181_v22 = vmul.f32 %v270_v13, %v61_v4  ;;  %v199_v23 = vmul.f32 %v179_v11, %v59_v59  ;;  %291 = vpow2.f32 %v167_v41  ;;  %v171_v55 = vmul.f32 1.442695, %v134_v40  ;;  %v71_v13 = vld [vmem:[#allocation2 + $0x70] sm:$0xff] }
  0x3f   :  { %v274_v24 = vpop.eup %273  ;;  %v182_v26 = vmul.f32 %v272_v19, %v62_v9  ;;  %v200_v27 = vmul.f32 %v180_v17, %v60_v62  ;;  %v218_v28 = vadd.f32 %v198_v18, %v197_v12  ;;  %293 = vpow2.f32 %v169_v48  ;;  %v72_v18 = vld [vmem:[#allocation2 + $0x78] sm:$0xff] }
  0x40   :  { %v276_v29 = vpop.eup %275  ;;  %v183_v34 = vmul.f32 %v274_v24, %v63_v20  ;;  %v201_v35 = vmul.f32 %v181_v22, %v61_v4  ;;  %v173_v61 = vmul.f32 1.442695, %v135_v47  ;;  %295 = vpow2.f32 %v171_v55 }
  0x41   :  { %v219_v36 = vadd.f32 %v218_v28, %v199_v23  ;;  %v278_v37 = vpop.eup %277  ;;  %v184_v42 = vmul.f32 %v276_v29, %v64_v30  ;;  %v202_v43 = vmul.f32 %v182_v26, %v62_v9  ;;  %v175_v3 = vmul.f32 1.442695, %v136_v54  ;;  %v73_v23 = vld [vmem:[#allocation2 + $0x80] sm:$0xff]  ;;  %v74_v28 = vld [vmem:[#allocation2 + $0x88] sm:$0xff] }
  0x42   :  { %v280_v45 = vpop.eup %279  ;;  %v185_v49 = vmul.f32 %v278_v37, %v65_v38  ;;  %v203_v50 = vmul.f32 %v183_v34, %v63_v20  ;;  %297 = vpow2.f32 %v173_v61 }
  0x43   :  { %v220_v44 = vadd.f32 %v219_v36, %v200_v27  ;;  %v282_v52 = vpop.eup %281  ;;  %v186_v56 = vmul.f32 %v280_v45, %v66_v46  ;;  %v204_v57 = vmul.f32 %v184_v42, %v64_v30  ;;  %299 = vpow2.f32 %v175_v3 }
  0x44   :  { %v284_v59 = vpop.eup %283  ;;  %v187_v62 = vmul.f32 %v282_v52, %v67_v53  ;;  %v205_v63 = vmul.f32 %v185_v49, %v65_v38  ;;  %v76_v38 = vld [vmem:[#allocation2 + $0x98] sm:$0xff] }
  0x45   :  { %v221_v51 = vadd.f32 %v220_v44, %v201_v35  ;;  %v286_v1 = vpop.eup %285  ;;  %v188_v4 = vmul.f32 %v284_v59, %v68_v60  ;;  %v206_v5 = vmul.f32 %v186_v56, %v66_v46 }
  0x46   :  { %v288_v7 = vpop.eup %287  ;;  %v189_v9 = vmul.f32 %v286_v1, %v69_v2  ;;  %v207_v10 = vmul.f32 %v187_v62, %v67_v53 }
  0x47   :  { %v222_v58 = vadd.f32 %v221_v51, %v202_v43  ;;  %v290_v12 = vpop.eup %289  ;;  %v190_v14 = vmul.f32 %v288_v7, %v70_v8  ;;  %v208_v15 = vmul.f32 %v188_v4, %v68_v60 }
  0x48   :  { %v292_v17 = vpop.eup %291  ;;  %v191_v19 = vmul.f32 %v290_v12, %v71_v13  ;;  %v209_v20 = vmul.f32 %v189_v9, %v69_v2 }
  0x49   :  { %v223_v0 = vadd.f32 %v222_v58, %v203_v50  ;;  %v294_v22 = vpop.eup %293  ;;  %v192_v24 = vmul.f32 %v292_v17, %v72_v18  ;;  %v210_v25 = vmul.f32 %v190_v14, %v70_v8 }
  0x4a   :  { %v296_v27 = vpop.eup %295  ;;  %v193_v29 = vmul.f32 %v294_v22, %v73_v23  ;;  %v211_v30 = vmul.f32 %v191_v19, %v71_v13 }
  0x4b   :  { %v224_v6 = vadd.f32 %v223_v0, %v204_v57  ;;  %v194_v34 = vmul.f32 %v296_v27, %v74_v28  ;;  %v212_v35 = vmul.f32 %v192_v24, %v72_v18 }
  0x4c   :  { %v298_v32 = vpop.eup %297  ;;  %v213_v40 = vmul.f32 %v193_v29, %v73_v23 }
  0x4d   :  { %v225_v11 = vadd.f32 %v224_v6, %v205_v63  ;;  %v300_v37 = vpop.eup %299  ;;  %v195_v39 = vmul.f32 %v298_v32, %v75_v33  ;;  %v214_v43 = vmul.f32 %v194_v34, %v74_v28 }
  0x4e   :  { %v196_v42 = vmul.f32 %v300_v37, %v76_v38 }
  0x4f   :  { %v226_v16 = vadd.f32 %v225_v11, %v206_v5  ;;  %v215_v45 = vmul.f32 %v195_v39, %v75_v33 }
  0x50   :  { %v216_v47 = vmul.f32 %v196_v42, %v76_v38 }
  0x51   :  { %v227_v21 = vadd.f32 %v226_v16, %v207_v10 }
  0x53   :  { %v228_v26 = vadd.f32 %v227_v21, %v208_v15 }
  0x55   :  { %v229_v31 = vadd.f32 %v228_v26, %v209_v20 }
  0x57   :  { %v230_v36 = vadd.f32 %v229_v31, %v210_v25 }
  0x59   :  { %v231_v41 = vadd.f32 %v230_v36, %v211_v30 }
  0x5b   :  { %v232_v44 = vadd.f32 %v231_v41, %v212_v35 }
  0x5d   :  { %v233_v46 = vadd.f32 %v232_v44, %v213_v40 }
  0x5f   :  { %v234_v48 = vadd.f32 %v233_v46, %v214_v43 }
  0x61   :  { %v235_v49 = vadd.f32 %v234_v48, %v215_v45 }
  0x63   :  { %v236_v50 = vadd.f32 %v235_v49, %v216_v47 }
  0x65   :  { %238 = vst [vmem:[#allocation7] sm:$0xff] %v236_v50 }
  0x66   :  { %356 = shalt.err (!%p353_p6)
}
  0x67   :  { %s357_s10 = scalar_lea.hbm %s431_s2, 128 }
  0x68   :  { %p358_p7 = scmp.ne.s32.totalorder %s431_s2, %s357_s10  ;;  %p361_p8 = scmp.lt.u32.totalorder %s357_s10, %s431_s2 }
  0x6a   :  { %p363_p9 = pnand %p361_p8, %p358_p7 }
  0x6c   :  { %366 = shalt.err (!%p363_p9)
}
  0x6d   :  { %248 = dma.vmem_to_hbm [thread:$0]  %s246_s6, 128, %s431_s2, [#allocation4]  }
  0x6e   :  { %371 = dma.done.wait [#allocation4], 128  }
  0x6f   :  { %372 = vsyncadd [#allocation4], 4294967168 }
  0x70   :  { %252 = vsyncpa [#allocation3], 1 }
  0x71   :  { %253 = vsyncpa [#allocation6], 1 }
  0x72   :  { %254 = vsyncpa [#allocation4], 1 }

</bundles_post_ra>
